<compile_context>
chip_gen: v7x
topology: tpu7x:2x2x1
jax: 0.10.0
libtpu: 0.0.40
codegen_flags: <defaults>
</compile_context>

<pallas_src>
import functools
import math

import jax
import jax.numpy as jnp
from jax import lax
from jax.experimental import pallas as pl
from jax.experimental.pallas import tpu as pltpu


def patch_proj_kernel(p_ref, w_ref, pos_ref, o_ref, *, matmul_dtype):
    """One grid step: (bb*P, K) @ (K, E) + pos  ->  (bb*P, E), one dense store."""
    lhs = p_ref[...]                               # (bb*P, K) f32 patch rows
    rhs = w_ref[...]                               # (K, E)    projection weight
    if matmul_dtype is not None:
        # In-kernel cast: MXU-native operands (v5e/v6e/v7x), f32 accumulation.
        lhs = lhs.astype(matmul_dtype)
        rhs = rhs.astype(matmul_dtype)
    proj = jnp.dot(lhs, rhs, preferred_element_type=jnp.float32)   # MXU, f32 acc
    # positions[1:] + conv bias, pre-tiled to (bb*P, E): one VPU add + one
    # full-block, sublane/lane-aligned store.
    o_ref[...] = (proj + pos_ref[...]).astype(o_ref.dtype)


def prepare_patch_embed_params(conv_w, conv_b, cls_token, positions):
    """One-time parameter prep (hoisted out of the per-call path)."""
    E, C, ph, pw = conv_w.shape
    K = C * ph * pw
    w_mat = conv_w.reshape(E, K).T                         # (K, E)
    pos_cls = positions[0:1] + cls_token.reshape(1, E)     # (1, E): pos[0] + cls
    pos_patch = positions[1:] + conv_b.reshape(1, E)       # (P, E): pos[1:] + bias
    return w_mat, pos_cls, pos_patch


def patch_embedding(x, w_mat, pos_cls, pos_patch, patchx=4, patchy=10,
                    matmul_dtype=None, out_dtype=None):
    """x: (B, C, H, W) NCHW.  Returns (B, 1 + num_patches, E)."""
    B, C, H, W = x.shape
    K, E = w_mat.shape
    assert W == patchy, "kernel covers full width (as in the reference module)"
    Hp = H // patchx
    P = Hp * (W // patchy)
    assert pos_patch.shape == (P, E)
    out_dtype = x.dtype if out_dtype is None else out_dtype

    # --- glue: non-overlapping patch extraction, (c, kh, kw) flatten order
    #     matches the OIHW conv-weight flattening, so conv == matmul.
    #     Patches stay f32 in HBM; any bf16 cast happens inside the kernel.
    patches = x.reshape(B, C, Hp, patchx, W)
    patches = jnp.transpose(patches, (0, 2, 1, 3, 4)).reshape(B * P, K)

    w_use = w_mat if matmul_dtype is None else w_mat.astype(matmul_dtype)  # tiny

    # ---- batch-block (bb) selection ------------------------------------------
    out_size = jnp.dtype(out_dtype).itemsize
    row_align = 16 if out_size < 4 else 8              # (8,128)/(16,128) tiling rule
    batch_align = row_align // math.gcd(P, row_align)  # bb multiple of this

    ROW_TARGET = 1024        # amortize ~0.35us/grid-step, fill MXU rows
    # Keep double-buffered per-step blocks comfortably inside scoped VMEM on all
    # generations (v5e default 16 MiB, v6e/v7x 32 MiB, v7x physical 64 MiB).
    bytes_per_row = K * 4 + E * (out_size + 4)
    vmem_row_cap = max(row_align, (20 << 20) // (2 * bytes_per_row))
    rows_target = min(ROW_TARGET, vmem_row_cap)

    bb = max(1, rows_target // P)
    bb = min(bb, B)
    if B >= 2 * batch_align:
        # v7x has 2 TensorCores: keep at least 2 "parallel" grid steps.
        bb = min(bb, -(-B // 2))
    bb = -(-bb // batch_align) * batch_align           # round UP to alignment
    grid_len = -(-B // bb)
    B_pad = grid_len * bb

    if B_pad != B:                                     # zero-pad tail batches
        patches = jnp.pad(patches, ((0, (B_pad - B) * P), (0, 0)))

    # positions[1:] + bias tiled once to the block height (tiny; DMA'd once,
    # reused by every grid step) -> single un-sliced VPU add in the kernel.
    pos_tiled = jnp.tile(pos_patch, (bb, 1))           # (bb*P, E) f32

    w_size = jnp.dtype(w_use.dtype).itemsize
    vmem_needed = 2 * (bb * P * K * 4 + bb * P * E * out_size
                       + bb * P * E * 4 + K * E * w_size)
    vmem_limit = None
    if vmem_needed > (12 << 20):
        vmem_limit = min(vmem_needed + (4 << 20), 48 << 20)

    kernel = functools.partial(patch_proj_kernel, matmul_dtype=matmul_dtype)
    out2d = pl.pallas_call(
        kernel,
        out_shape=jax.ShapeDtypeStruct((B_pad * P, E), out_dtype),
        grid_spec=pltpu.PrefetchScalarGridSpec(
            num_scalar_prefetch=0,
            grid=(grid_len,),
            in_specs=[
                pl.BlockSpec((bb * P, K), lambda g: (g, 0)),   # patch rows (f32)
                pl.BlockSpec((K, E), lambda g: (0, 0)),        # projection weight
                pl.BlockSpec((bb * P, E), lambda g: (0, 0)),   # pos[1:]+bias, tiled
            ],
            out_specs=pl.BlockSpec((bb * P, E), lambda g: (g, 0)),
        ),
        compiler_params=pltpu.CompilerParams(
            dimension_semantics=("parallel",),
            vmem_limit_bytes=vmem_limit),
    )(patches, w_use, pos_tiled)

    # Final assembly in the wrapper: the cls row is batch-invariant
    # (positions[0] + cls_token), so it never enters the kernel.
    patch_out = out2d[: B * P].reshape(B, P, E)
    cls_rows = jnp.broadcast_to(pos_cls.astype(out_dtype).reshape(1, 1, E),
                                (B, 1, E))
    return jnp.concatenate([cls_rows, patch_out], axis=1)


def reference(x, conv_w, conv_b, cls_token, positions, patchx=4, patchy=10):
    """Pure-JAX reference mirroring the PyTorch forward (NCHW conv)."""
    B = x.shape[0]
    y = lax.conv_general_dilated(
        x, conv_w, window_strides=(patchx, patchx),
        padding="VALID",
        dimension_numbers=("NCHW", "OIHW", "NCHW"))          # (B,E,Hp,Wp)
    y = y + conv_b[None, :, None, None]
    B_, E, Hp, Wp = y.shape
    y = jnp.transpose(y, (0, 2, 3, 1)).reshape(B_, Hp * Wp, E)  # b (h w) e
    cls = jnp.broadcast_to(cls_token.reshape(1, 1, E), (B, 1, E))
    y = jnp.concatenate([cls, y], axis=1)
    return y + positions[None]


if __name__ == "__main__":
    # Small shapes consistent with the module:
    # in_channels=1, patchx=4, patchy=10, imgx=16, imgy=10, emb=128 -> P=4, seq=5
    B, C, H, W = 2, 1, 16, 10
    PX, PY, E = 4, 10, 128
    P = (H // PX) * (W // PY)

    key = jax.random.PRNGKey(0)
    kx, kw, kb, kc, kp, kx2 = jax.random.split(key, 6)
    x = jax.random.normal(kx, (B, C, H, W), dtype=jnp.float32)
    conv_w = jax.random.normal(kw, (E, C, PX, PY), dtype=jnp.float32) * 0.05
    conv_b = jax.random.normal(kb, (E,), dtype=jnp.float32) * 0.05
    cls_token = jax.random.normal(kc, (1, 1, E), dtype=jnp.float32)
    positions = jax.random.normal(kp, (P + 1, E), dtype=jnp.float32)

    w_mat, pos_cls, pos_patch = prepare_patch_embed_params(
        conv_w, conv_b, cls_token, positions)

    ref = reference(x, conv_w, conv_b, cls_token, positions, PX, PY)

    # 1) f32 path (exact semantics of the PyTorch module)
    out = patch_embedding(x, w_mat, pos_cls, pos_patch, PX, PY)
    out = jax.block_until_ready(out)
    assert out.shape == ref.shape == (B, P + 1, E)
    assert jnp.allclose(out, ref, atol=1e-4, rtol=1e-4), "f32 mismatch vs reference"

    # 2) bf16-operand path (MXU fast path on v5e/v6e/v7x, f32 accumulation)
    out_bf16 = patch_embedding(x, w_mat, pos_cls, pos_patch, PX, PY,
                               matmul_dtype=jnp.bfloat16)
    out_bf16 = jax.block_until_ready(out_bf16)
    assert jnp.allclose(out_bf16, ref, atol=5e-2, rtol=5e-2), "bf16 mismatch vs ref"

    # 3) awkward batch size -> grid > 1 + zero-padded tail (8-aligned blocks)
    B2 = 10
    x2 = jax.random.normal(kx2, (B2, C, H, W), dtype=jnp.float32)
    ref2 = reference(x2, conv_w, conv_b, cls_token, positions, PX, PY)
    out2 = patch_embedding(x2, w_mat, pos_cls, pos_patch, PX, PY)
    out2 = jax.block_until_ready(out2)
    assert out2.shape == ref2.shape == (B2, P + 1, E)
    assert jnp.allclose(out2, ref2, atol=1e-4, rtol=1e-4), "padded-grid mismatch"

    # 4) bf16 output slab (halves writeback on the mem-bound path; 16-row blocks)
    out2_bf = patch_embedding(x2, w_mat, pos_cls, pos_patch, PX, PY,
                              matmul_dtype=jnp.bfloat16, out_dtype=jnp.bfloat16)
    out2_bf = jax.block_until_ready(out2_bf)
    assert jnp.allclose(out2_bf.astype(jnp.float32), ref2,
                        atol=5e-2, rtol=5e-2), "bf16-out mismatch vs reference"

    print("KERNEL_OK")
</pallas_src>

<mosaic_0001>
module attributes {stable_mosaic.version = 11 : i64} {
  func.func @patch_proj_kernel(%arg0: i32, %arg1: memref<8x40xf32, #tpu.memory_space<vmem>>, %arg2: memref<40x128xf32, #tpu.memory_space<vmem>>, %arg3: memref<8x128xf32, #tpu.memory_space<vmem>>, %arg4: memref<8x128xf32, #tpu.memory_space<vmem>>) attributes {dimension_semantics = [#tpu.dimension_semantics<parallel>], iteration_bounds = array<i64: 1>, scalar_prefetch = 0 : i64, scratch_operands = 0 : i64, tpu.core_type = #tpu.core_type<tc>, window_params = [{transform_indices = @transform_0, window_bounds = array<i64: 8, 40>}, {pipeline_mode = #tpu.pipeline_mode<synchronous>, transform_indices = @transform_1, window_bounds = array<i64: 40, 128>}, {pipeline_mode = #tpu.pipeline_mode<synchronous>, transform_indices = @transform_2, window_bounds = array<i64: 8, 128>}, {transform_indices = @transform_3, window_bounds = array<i64: 8, 128>}]} {
    %c0 = arith.constant 0 : index
    %c0_0 = arith.constant 0 : index
    %0 = vector.load %arg1[%c0, %c0_0] : memref<8x40xf32, #tpu.memory_space<vmem>>, vector<8x40xf32>
    %c0_1 = arith.constant 0 : index
    %c0_2 = arith.constant 0 : index
    %1 = vector.load %arg2[%c0_1, %c0_2] : memref<40x128xf32, #tpu.memory_space<vmem>>, vector<40x128xf32>
    %cst = arith.constant dense<0.000000e+00> : vector<8x128xf32>
    %2 = tpu.matmul %0, %1, %cst {dimension_numbers = #tpu.dot_dimension_numbers<[1], [0], [0], [1], [0, 0, 1, 1], [], []>} : vector<8x40xf32>, vector<40x128xf32>, vector<8x128xf32> -> vector<8x128xf32>
    %c0_3 = arith.constant 0 : index
    %c0_4 = arith.constant 0 : index
    %3 = vector.load %arg3[%c0_3, %c0_4] : memref<8x128xf32, #tpu.memory_space<vmem>>, vector<8x128xf32>
    %4 = arith.addf %2, %3 : vector<8x128xf32>
    %c0_5 = arith.constant 0 : index
    %c0_6 = arith.constant 0 : index
    %5 = vector.load %arg4[%c0_5, %c0_6] : memref<8x128xf32, #tpu.memory_space<vmem>>, vector<8x128xf32>
    tpu.vector_store %arg4[%c0_5, %c0_6], %4 {strides = array<i32>} : memref<8x128xf32, #tpu.memory_space<vmem>>, vector<8x128xf32>,
    return
  }
  func.func @transform_0(%arg0: i32) -> (i32, i32) {
    %c0_i32 = arith.constant 0 : i32
    %c0_i32_0 = arith.constant 0 : i32
    return %arg0, %c0_i32 : i32, i32
  }
  func.func @transform_1(%arg0: i32) -> (i32, i32) {
    %c0_i32 = arith.constant 0 : i32
    %c0_i32_0 = arith.constant 0 : i32
    %c0_i32_1 = arith.constant 0 : i32
    return %c0_i32, %c0_i32_0 : i32, i32
  }
  func.func @transform_2(%arg0: i32) -> (i32, i32) {
    %c0_i32 = arith.constant 0 : i32
    %c0_i32_0 = arith.constant 0 : i32
    %c0_i32_1 = arith.constant 0 : i32
    return %c0_i32, %c0_i32_0 : i32, i32
  }
  func.func @transform_3(%arg0: i32) -> (i32, i32) {
    %c0_i32 = arith.constant 0 : i32
    %c0_i32_0 = arith.constant 0 : i32
    return %arg0, %c0_i32 : i32, i32
  }
}

</mosaic_0001>

<bundles_post_ra>
// kernel: tpu_custom_call.1
= control target key start
LH: loop header
LB: loop body
LE: loop exit
PB: predicated region body
PF: predicated region fallthrough
CT: control target
= control target key end

     0   :  { %8 = vsyncpa [#allocation3], 0  ;;  %s356_s0 = inlined_call_operand.hbm [shape: f32[8,40], index: 0, kind: input, shape index: {}]   ;;  %s357_s1 = inlined_call_operand.hbm [shape: f32[40,128], index: 1, kind: input, shape index: {}]   ;;  %s358_s2 = inlined_call_operand.hbm [shape: f32[8,128], index: 2, kind: input, shape index: {}]   ;;  %s359_s3 = inlined_call_operand.hbm [shape: f32[8,128], index: 3, kind: output, shape index: {}]  }
   0x1   :  { %9 = vsyncpa [#allocation6], 0 }
   0x2   :  { %10 = vsyncpa [#allocation4], 0  ;;  %s279_s12 = smov [#allocation5]   ;;  %s185_s16 = scalar_lea.hbm %s357_s1, 640 }
   0x3   :  { %s26_s13 = sshll.u32 %s279_s12, 4  ;;  %p186_p0 = scmp.ne.s32.totalorder %s357_s1, %s185_s16  ;;  %s27_s13 = int_to_ptr.vmem [resolvable:$true] %s26_s13 }
   0x4   :  { %p189_p1 = scmp.lt.u32.totalorder %s185_s16, %s357_s1 }
   0x6   :  { %p191_p2 = pnand %p189_p1, %p186_p0 }
   0x8   :  { %194 = shalt.err (!%p191_p2)
}
   0x9   :  { %s195_s21 = scalar_lea.vmem %s27_s13, 640  ;;  %p200_p4 = scmp.lt.s32.totalorder %s27_s13, %s27_s13 }
   0xa   :  { %p196_p3 = scmp.ne.s32.totalorder %s27_s13, %s195_s21  ;;  %p201_p5 = scmp.lt.s32.totalorder %s195_s21, %s195_s21 }
   0xc   :  { %p202_p6 = por %p201_p5, %p200_p4 }
   0xe   :  { %p203_p7 = pnand %p202_p6, %p196_p3 }
  0x10   :  { %206 = shalt.err (!%p203_p7)
}
  0x11   :  { %s280_s22 = smov 128   ;;  %s281_s23 = smov 8  }
  0x12   :  { %32 = dma.hbm_to_vmem [thread:$0]  %s357_s1, 640, %s27_s13, [#allocation6], %s280_s22, %s280_s22, %s281_s23  }
  0x13   :  { %s282_s26 = smov [#allocation2]   ;;  %s283_s28 = smov [#allocation7]  }
  0x14   :  { %s17_s27 = sshll.u32 %s282_s26, 4  ;;  %s39_s29 = sshll.u32 %s283_s28, 4  ;;  %s18_s27 = int_to_ptr.vmem [resolvable:$true] %s17_s27  ;;  %s40_s29 = int_to_ptr.vmem [resolvable:$true] %s39_s29 }
  0x15   :  { %s207_s5 = scalar_lea.hbm %s356_s0, 128 }
  0x16   :  { %p208_p8 = scmp.ne.s32.totalorder %s356_s0, %s207_s5  ;;  %p211_p9 = scmp.lt.u32.totalorder %s207_s5, %s356_s0 }
  0x18   :  { %p213_p10 = pnand %p211_p9, %p208_p8 }
  0x1a   :  { %216 = shalt.err (!%p213_p10)
}
  0x1b   :  { %s217_s1 = scalar_lea.vmem %s18_s27, 128  ;;  %p222_p12 = scmp.lt.s32.totalorder %s18_s27, %s18_s27 }
  0x1c   :  { %p218_p11 = scmp.ne.s32.totalorder %s18_s27, %s217_s1  ;;  %p223_p13 = scmp.lt.s32.totalorder %s217_s1, %s217_s1 }
  0x1e   :  { %p224_p0 = por %p223_p13, %p222_p12 }
  0x20   :  { %p225_p1 = pnand %p224_p0, %p218_p11 }
  0x22   :  { %228 = shalt.err (!%p225_p1)
}
  0x23   :  { %20 = dma.hbm_to_vmem [thread:$0]  %s356_s0, 128, %s18_s27, [#allocation3]  }
  0x24   :  { %s229_s14 = scalar_lea.hbm %s358_s2, 128 }
  0x25   :  { %p230_p2 = scmp.ne.s32.totalorder %s358_s2, %s229_s14  ;;  %p233_p3 = scmp.lt.u32.totalorder %s229_s14, %s358_s2 }
  0x27   :  { %p235_p4 = pnand %p233_p3, %p230_p2 }
  0x29   :  { %238 = shalt.err (!%p235_p4)
}
  0x2a   :  { %s239_s19 = scalar_lea.vmem %s40_s29, 128  ;;  %p244_p6 = scmp.lt.s32.totalorder %s40_s29, %s40_s29 }
  0x2b   :  { %p240_p5 = scmp.ne.s32.totalorder %s40_s29, %s239_s19  ;;  %p245_p7 = scmp.lt.s32.totalorder %s239_s19, %s239_s19 }
  0x2d   :  { %p246_p8 = por %p245_p7, %p244_p6 }
  0x2f   :  { %p247_p9 = pnand %p246_p8, %p240_p5 }
  0x31   :  { %250 = shalt.err (!%p247_p9)
}
  0x32   :  { %42 = dma.hbm_to_vmem [thread:$0]  %s358_s2, 128, %s40_s29, [#allocation6]  }
  0x33   :  { %273 = dma.done.wait [#allocation3], 128  }
  0x34   :  { %274 = vsyncadd [#allocation3], 4294967168 }
  0x35   :  { %275 = dma.done.wait [#allocation6], 768  }
  0x36   :  { %276 = vsyncadd [#allocation6], 4294966528  ;;  %v284_v0 = vmov 0.0|0.0   ;;  %vm285_vm0 = vmmov 0   ;;  %v286_v1 = vmov 0.0   ;;  %v53_v2 = vld [vmem:[#allocation5] sm:$0xff] }
  0x37   :  { %170 = vmatprep.subr.bf16.mxu0 %v284_v0  ;;  %167 = vmatprep.mubr.msk.f32.mxu0 %vm285_vm0, %v286_v1  ;;  %v54_v3 = vld [vmem:[#allocation5 + $0x8] sm:$0xff]  ;;  %v55_v4 = vld [vmem:[#allocation5 + $0x10] sm:$0xff]  ;;  %v56_v6 = vld [vmem:[#allocation5 + $0x18] sm:$0xff]  ;;  %vm59_vm1 = vcmask 326656   ;;  %s287_s2 = smov [#allocation8]  }
  0x38   :  { %v171_v5 = vpack.c.bf16 %v54_v3, %v53_v2  ;;  %v174_v7 = vpack.c.bf16 %v56_v6, %v55_v4  ;;  %v57_v8 = vld [vmem:[#allocation5 + $0x20] sm:$0xff]  ;;  %v52_v9 = vld [vmem:[#allocation2] sm:$0xff]  ;;  %v58_v10 = vld [vmem:[#allocation7] sm:$0xff]  ;;  %s140_s21 = sshll.u32 %s287_s2, 4  ;;  %s141_s21 = int_to_ptr.vmem [resolvable:$true] %s140_s21 }
  0x39   :  { %s251_s22 = scalar_lea.vmem %s141_s21, 128  ;;  %p256_p11 = scmp.lt.s32.totalorder %s141_s21, %s141_s21 }
  0x3a   :  { %172 = vmatpush3.bf16.msra.mxu0 %v171_v5  ;;  %p252_p10 = scmp.ne.s32.totalorder %s141_s21, %s251_s22  ;;  %p257_p12 = scmp.lt.s32.totalorder %s251_s22, %s251_s22 }
  0x3b   :  { %173 = vmatprep.subr.bf16.mxu0 %v284_v0 }
  0x3c   :  { %p258_p13 = por %p257_p12, %p256_p11 }
  0x3e   :  { %175 = vmatpush3.bf16.msra.mxu0 %v174_v7  ;;  %p259_p0 = pnand %p258_p13, %p252_p10 }
  0x3f   :  { %165 = vmatprep.subr.mxu0 %v286_v1 }
  0x42   :  { %166 = vmatpush3.msra.mxu0 %v57_v8 }
  0x43   :  { %168 = vmatmul.mubr.msk.f32.vlgmr.msra.gmra.mrb[0].mxu0 %vm59_vm1, %v52_v9 }
 0x116   :  { %v129_v11 = vpop.f32.mrb[0].mxu0 }
 0x117   :  { %v130_v12 = vadd.f32 %v129_v11, %v58_v10  ;;  %v169_v13 = vpop.f32.mrb[1].mxu0 }
 0x119   :  { %133 = vst [vmem:[#allocation8] sm:$0xff] %v130_v12 }
 0x11a   :  { %262 = shalt.err (!%p259_p0)
}
 0x11b   :  { %s263_s25 = scalar_lea.hbm %s359_s3, 128 }
 0x11c   :  { %p264_p1 = scmp.ne.s32.totalorder %s359_s3, %s263_s25  ;;  %p267_p2 = scmp.lt.u32.totalorder %s263_s25, %s359_s3 }
 0x11e   :  { %p269_p3 = pnand %p267_p2, %p264_p1 }
 0x120   :  { %272 = shalt.err (!%p269_p3)
}
 0x121   :  { %143 = dma.vmem_to_hbm [thread:$0]  %s141_s21, 128, %s359_s3, [#allocation4]  }
 0x122   :  { %277 = dma.done.wait [#allocation4], 128  }
 0x123   :  { %278 = vsyncadd [#allocation4], 4294967168 }
 0x124   :  { %147 = vsyncpa [#allocation3], 1 }
 0x125   :  { %148 = vsyncpa [#allocation6], 1 }
 0x126   :  { %149 = vsyncpa [#allocation4], 1 }

</bundles_post_ra>
